<compile_context>
chip_gen: v6e
topology: v6e:2x2x1
jax: 0.10.0
libtpu: 0.0.40
codegen_flags: <defaults>
</compile_context>

<pallas_src>
import functools

import jax
import jax.numpy as jnp
from jax.experimental import pallas as pl
from jax.experimental.pallas import tpu as pltpu

_LANE = 128
_ROW_ALIGN = 16  # multiple of 16 keeps bf16 (16,128) and f32 (8,128) tilings happy


def _round_up(x, m):
    return ((x + m - 1) // m) * m


def _mlp_kernel(x_ref,
                w1_ref, b1_ref,
                w2_ref, b2_ref,
                w3_ref, b3_ref,
                w4_ref, b4_ref,
                o_ref):
    # Cast narrow input dtypes to f32 in-kernel (free on the VPU).
    x = x_ref[...].astype(jnp.float32)
    # Layer 1: Linear + ReLU
    h = jnp.dot(x, w1_ref[...], preferred_element_type=jnp.float32) + b1_ref[...]
    h = jnp.maximum(h, 0.0)
    # Layer 2: Linear + ReLU
    h = jnp.dot(h, w2_ref[...], preferred_element_type=jnp.float32) + b2_ref[...]
    h = jnp.maximum(h, 0.0)
    # Layer 3: Linear + Sigmoid (exp -> EUP slot, reciprocal -> EUP vrcp)
    h = jnp.dot(h, w3_ref[...], preferred_element_type=jnp.float32) + b3_ref[...]
    h = pl.reciprocal(1.0 + jnp.exp(-h), approx=True)
    # Layer 4: Linear (output weight pre-padded to a lane-dense 128-wide output);
    # store bf16 to halve the HBM write traffic (lane-dense, unmasked vst).
    o_ref[...] = (jnp.dot(h, w4_ref[...], preferred_element_type=jnp.float32)
                  + b4_ref[...]).astype(o_ref.dtype)


def prepare_params(params):
    """One-time preprocessing: transpose weights to (in, out), make biases (1, out),
    and zero-pad the last layer's output dim to a multiple of 128 lanes."""
    (W1, b1), (W2, b2), (W3, b3), (W4, b4) = params
    out_units = W4.shape[0]
    padded_out = _round_up(out_units, _LANE)

    def wt(W):
        return jnp.asarray(W, jnp.float32).T

    def bias(b):
        return jnp.asarray(b, jnp.float32).reshape(1, -1)

    w4 = jnp.zeros((W4.shape[1], padded_out), jnp.float32).at[:, :out_units].set(wt(W4))
    b4 = jnp.zeros((1, padded_out), jnp.float32).at[:, :out_units].set(bias(b4))
    return (wt(W1), bias(b1), wt(W2), bias(b2), wt(W3), bias(b3), w4, b4)


def _choose_batch_tile(B, block_b, min_blocks):
    """Pick a batch tile: as large as possible up to block_b, at least `min_blocks`
    grid steps (v7x megacore), and minimal padded-batch waste."""
    num_blocks = max(min_blocks, pl.cdiv(B, block_b))
    tb = _round_up(pl.cdiv(B, num_blocks), _ROW_ALIGN)
    num_blocks = pl.cdiv(B, tb)          # recompute with the aligned tile
    padded_b = num_blocks * tb
    return tb, num_blocks, padded_b


@functools.partial(jax.jit, static_argnames=("out_units", "block_b", "min_blocks"))
def nonlinear_fmnist_forward(x, prepared, *, out_units, block_b=4096, min_blocks=2):
    """x: (B, ...) -> flattened to (B, input_units); prepared: output of prepare_params().

    block_b: max rows per grid step (2048-8192 recommended; keep <=4096 on v5e).
    min_blocks: minimum grid steps so v7x's two TensorCores both get work.
    """
    B = x.shape[0]
    x2d = x.reshape(B, -1)               # nn.Flatten; keep native dtype (cast in-kernel)
    in_units = x2d.shape[1]

    w1, b1, w2, b2, w3, b3, w4, b4 = prepared
    hidden = w1.shape[1]
    padded_out = w4.shape[1]

    tb, num_blocks, padded_b = _choose_batch_tile(B, block_b, min_blocks)
    if padded_b != B:
        x2d = jnp.pad(x2d, ((0, padded_b - B), (0, 0)))

    # Full-array (resident) specs for the small weights/biases.
    def full_spec(arr):
        return pl.BlockSpec(arr.shape, lambda i: (0, 0))

    x_bytes = padded_b * in_units * x2d.dtype.itemsize
    out_bytes = padded_b * padded_out * 2          # bf16 output
    w_bytes = 4 * (in_units * hidden + 2 * hidden * hidden + hidden * padded_out
                   + 3 * hidden + padded_out)
    flops = 2 * padded_b * (in_units * hidden + 2 * hidden * hidden + hidden * padded_out)

    out_padded = pl.pallas_call(
        _mlp_kernel,
        out_shape=jax.ShapeDtypeStruct((padded_b, padded_out), jnp.bfloat16),
        grid_spec=pltpu.PrefetchScalarGridSpec(
            num_scalar_prefetch=0,
            grid=(num_blocks,),
            in_specs=[
                pl.BlockSpec((tb, in_units), lambda i: (i, 0)),
                full_spec(w1), full_spec(b1),
                full_spec(w2), full_spec(b2),
                full_spec(w3), full_spec(b3),
                full_spec(w4), full_spec(b4),
            ],
            out_specs=pl.BlockSpec((tb, padded_out), lambda i: (i, 0)),
        ),
        compiler_params=pltpu.CompilerParams(
            dimension_semantics=("parallel",)),
        cost_estimate=pl.CostEstimate(
            flops=flops,
            transcendentals=padded_b * hidden,      # sigmoid exp
            bytes_accessed=x_bytes + out_bytes + w_bytes),
    )(x2d, w1, b1, w2, b2, w3, b3, w4, b4)

    return out_padded[:B, :out_units].astype(jnp.float32)


def init_linear(key, in_features, out_features):
    """Deterministic PyTorch-style init: U(-1/sqrt(fan_in), 1/sqrt(fan_in))."""
    kw, kb = jax.random.split(key)
    bound = 1.0 / jnp.sqrt(jnp.float32(in_features))
    W = jax.random.uniform(kw, (out_features, in_features), jnp.float32, -bound, bound)
    b = jax.random.uniform(kb, (out_features,), jnp.float32, -bound, bound)
    return W, b


if __name__ == "__main__":
    # Small shapes consistent with the module: input image (2, 1, 8, 8) -> 64 input units.
    input_units, hidden_units, output_units = 64, 32, 10
    B, C, H, W = 2, 1, 8, 8

    root = jax.random.PRNGKey(0)
    kx, k1, k2, k3, k4 = jax.random.split(root, 5)
    x = jax.random.normal(kx, (B, C, H, W), jnp.float32)

    params = [
        init_linear(k1, input_units, hidden_units),
        init_linear(k2, hidden_units, hidden_units),
        init_linear(k3, hidden_units, hidden_units),
        init_linear(k4, hidden_units, output_units),
    ]

    prepared = prepare_params(params)   # one-time glue, outside the hot path
    out = nonlinear_fmnist_forward(x, prepared, out_units=output_units)
    out = jax.block_until_ready(out)

    # Pure-JAX reference (same math as the torch module, f32 end to end).
    ref = x.reshape(B, -1)
    ref = jnp.maximum(ref @ params[0][0].T + params[0][1], 0.0)
    ref = jnp.maximum(ref @ params[1][0].T + params[1][1], 0.0)
    ref = 1.0 / (1.0 + jnp.exp(-(ref @ params[2][0].T + params[2][1])))
    ref = ref @ params[3][0].T + params[3][1]

    assert out.shape == (B, output_units)
    # bf16 output store + approx reciprocal => slightly relaxed tolerance.
    assert jnp.allclose(out, ref, atol=2e-2, rtol=2e-2), float(jnp.max(jnp.abs(out - ref)))

    print("KERNEL_OK")
</pallas_src>

<mosaic_0001>
module attributes {stable_mosaic.version = 11 : i64} {
  func.func @_mlp_kernel(%arg0: i32, %arg1: memref<16x64xf32, #tpu.memory_space<vmem>>, %arg2: memref<64x32xf32, #tpu.memory_space<vmem>>, %arg3: memref<1x32xf32, #tpu.memory_space<vmem>>, %arg4: memref<32x32xf32, #tpu.memory_space<vmem>>, %arg5: memref<1x32xf32, #tpu.memory_space<vmem>>, %arg6: memref<32x32xf32, #tpu.memory_space<vmem>>, %arg7: memref<1x32xf32, #tpu.memory_space<vmem>>, %arg8: memref<32x128xf32, #tpu.memory_space<vmem>>, %arg9: memref<1x128xf32, #tpu.memory_space<vmem>>, %arg10: memref<16x128xbf16, #tpu.memory_space<vmem>>) attributes {dimension_semantics = [#tpu.dimension_semantics<parallel>], iteration_bounds = array<i64: 1>, scalar_prefetch = 0 : i64, scratch_operands = 0 : i64, tpu.core_type = #tpu.core_type<tc>, window_params = [{transform_indices = @transform_0, window_bounds = array<i64: 16, 64>}, {pipeline_mode = #tpu.pipeline_mode<synchronous>, transform_indices = @transform_1, window_bounds = array<i64: 64, 32>}, {pipeline_mode = #tpu.pipeline_mode<synchronous>, transform_indices = @transform_2, window_bounds = array<i64: 1, 32>}, {pipeline_mode = #tpu.pipeline_mode<synchronous>, transform_indices = @transform_3, window_bounds = array<i64: 32, 32>}, {pipeline_mode = #tpu.pipeline_mode<synchronous>, transform_indices = @transform_4, window_bounds = array<i64: 1, 32>}, {pipeline_mode = #tpu.pipeline_mode<synchronous>, transform_indices = @transform_5, window_bounds = array<i64: 32, 32>}, {pipeline_mode = #tpu.pipeline_mode<synchronous>, transform_indices = @transform_6, window_bounds = array<i64: 1, 32>}, {pipeline_mode = #tpu.pipeline_mode<synchronous>, transform_indices = @transform_7, window_bounds = array<i64: 32, 128>}, {pipeline_mode = #tpu.pipeline_mode<synchronous>, transform_indices = @transform_8, window_bounds = array<i64: 1, 128>}, {transform_indices = @transform_9, window_bounds = array<i64: 16, 128>}]} {
    %c0 = arith.constant 0 : index
    %c0_0 = arith.constant 0 : index
    %0 = vector.load %arg1[%c0, %c0_0] : memref<16x64xf32, #tpu.memory_space<vmem>>, vector<16x64xf32>
    %c0_1 = arith.constant 0 : index
    %c0_2 = arith.constant 0 : index
    %1 = vector.load %arg2[%c0_1, %c0_2] : memref<64x32xf32, #tpu.memory_space<vmem>>, vector<64x32xf32>
    %cst = arith.constant dense<0.000000e+00> : vector<16x32xf32>
    %2 = tpu.matmul %0, %1, %cst {dimension_numbers = #tpu.dot_dimension_numbers<[1], [0], [0], [1], [0, 0, 1, 1], [], []>} : vector<16x64xf32>, vector<64x32xf32>, vector<16x32xf32> -> vector<16x32xf32>
    %c0_3 = arith.constant 0 : index
    %c0_4 = arith.constant 0 : index
    %3 = vector.load %arg3[%c0_3, %c0_4] : memref<1x32xf32, #tpu.memory_space<vmem>>, vector<1x32xf32>
    %4 = vector.broadcast %3 : vector<1x32xf32> to vector<16x32xf32>
    %5 = arith.addf %2, %4 : vector<16x32xf32>
    %cst_5 = arith.constant 0.000000e+00 : f32
    %6 = vector.broadcast %cst_5 : f32 to vector<16x32xf32>
    %7 = arith.maximumf %5, %6 : vector<16x32xf32>
    %c0_6 = arith.constant 0 : index
    %c0_7 = arith.constant 0 : index
    %8 = vector.load %arg4[%c0_6, %c0_7] : memref<32x32xf32, #tpu.memory_space<vmem>>, vector<32x32xf32>
    %cst_8 = arith.constant dense<0.000000e+00> : vector<16x32xf32>
    %9 = tpu.matmul %7, %8, %cst_8 {dimension_numbers = #tpu.dot_dimension_numbers<[1], [0], [0], [1], [0, 0, 1, 1], [], []>} : vector<16x32xf32>, vector<32x32xf32>, vector<16x32xf32> -> vector<16x32xf32>
    %c0_9 = arith.constant 0 : index
    %c0_10 = arith.constant 0 : index
    %10 = vector.load %arg5[%c0_9, %c0_10] : memref<1x32xf32, #tpu.memory_space<vmem>>, vector<1x32xf32>
    %11 = vector.broadcast %10 : vector<1x32xf32> to vector<16x32xf32>
    %12 = arith.addf %9, %11 : vector<16x32xf32>
    %cst_11 = arith.constant 0.000000e+00 : f32
    %13 = vector.broadcast %cst_11 : f32 to vector<16x32xf32>
    %14 = arith.maximumf %12, %13 : vector<16x32xf32>
    %c0_12 = arith.constant 0 : index
    %c0_13 = arith.constant 0 : index
    %15 = vector.load %arg6[%c0_12, %c0_13] : memref<32x32xf32, #tpu.memory_space<vmem>>, vector<32x32xf32>
    %cst_14 = arith.constant dense<0.000000e+00> : vector<16x32xf32>
    %16 = tpu.matmul %14, %15, %cst_14 {dimension_numbers = #tpu.dot_dimension_numbers<[1], [0], [0], [1], [0, 0, 1, 1], [], []>} : vector<16x32xf32>, vector<32x32xf32>, vector<16x32xf32> -> vector<16x32xf32>
    %c0_15 = arith.constant 0 : index
    %c0_16 = arith.constant 0 : index
    %17 = vector.load %arg7[%c0_15, %c0_16] : memref<1x32xf32, #tpu.memory_space<vmem>>, vector<1x32xf32>
    %18 = vector.broadcast %17 : vector<1x32xf32> to vector<16x32xf32>
    %19 = arith.addf %16, %18 : vector<16x32xf32>
    %cst_17 = arith.constant 0.000000e+00 : f32
    %20 = vector.broadcast %cst_17 : f32 to vector<16x32xf32>
    %21 = arith.subf %20, %19 : vector<16x32xf32>
    %22 = math.exp %21 : vector<16x32xf32>
    %cst_18 = arith.constant 1.000000e+00 : f32
    %23 = vector.broadcast %cst_18 : f32 to vector<16x32xf32>
    %24 = arith.addf %23, %22 : vector<16x32xf32>
    %25 = tpu.reciprocal %24 {approx = true} : vector<16x32xf32> -> vector<16x32xf32>
    %c0_19 = arith.constant 0 : index
    %c0_20 = arith.constant 0 : index
    %26 = vector.load %arg8[%c0_19, %c0_20] : memref<32x128xf32, #tpu.memory_space<vmem>>, vector<32x128xf32>
    %cst_21 = arith.constant dense<0.000000e+00> : vector<16x128xf32>
    %27 = tpu.matmul %25, %26, %cst_21 {dimension_numbers = #tpu.dot_dimension_numbers<[1], [0], [0], [1], [0, 0, 1, 1], [], []>} : vector<16x32xf32>, vector<32x128xf32>, vector<16x128xf32> -> vector<16x128xf32>
    %c0_22 = arith.constant 0 : index
    %c0_23 = arith.constant 0 : index
    %28 = vector.load %arg9[%c0_22, %c0_23] : memref<1x128xf32, #tpu.memory_space<vmem>>, vector<1x128xf32>
    %29 = vector.broadcast %28 : vector<1x128xf32> to vector<16x128xf32>
    %30 = arith.addf %27, %29 : vector<16x128xf32>
    %31 = arith.truncf %30 : vector<16x128xf32> to vector<16x128xbf16>
    %c0_24 = arith.constant 0 : index
    %c0_25 = arith.constant 0 : index
    %32 = vector.load %arg10[%c0_24, %c0_25] : memref<16x128xbf16, #tpu.memory_space<vmem>>, vector<16x128xbf16>
    tpu.vector_store %arg10[%c0_24, %c0_25], %31 {strides = array<i32>} : memref<16x128xbf16, #tpu.memory_space<vmem>>, vector<16x128xbf16>,
    return
  }
  func.func @transform_0(%arg0: i32) -> (i32, i32) {
    %c0_i32 = arith.constant 0 : i32
    %c0_i32_0 = arith.constant 0 : i32
    return %arg0, %c0_i32 : i32, i32
  }
  func.func @transform_1(%arg0: i32) -> (i32, i32) {
    %c0_i32 = arith.constant 0 : i32
    %c0_i32_0 = arith.constant 0 : i32
    %c0_i32_1 = arith.constant 0 : i32
    return %c0_i32, %c0_i32_0 : i32, i32
  }
  func.func @transform_2(%arg0: i32) -> (i32, i32) {
    %c0_i32 = arith.constant 0 : i32
    %c0_i32_0 = arith.constant 0 : i32
    %c0_i32_1 = arith.constant 0 : i32
    return %c0_i32, %c0_i32_0 : i32, i32
  }
  func.func @transform_3(%arg0: i32) -> (i32, i32) {
    %c0_i32 = arith.constant 0 : i32
    %c0_i32_0 = arith.constant 0 : i32
    %c0_i32_1 = arith.constant 0 : i32
    return %c0_i32, %c0_i32_0 : i32, i32
  }
  func.func @transform_4(%arg0: i32) -> (i32, i32) {
    %c0_i32 = arith.constant 0 : i32
    %c0_i32_0 = arith.constant 0 : i32
    %c0_i32_1 = arith.constant 0 : i32
    return %c0_i32, %c0_i32_0 : i32, i32
  }
  func.func @transform_5(%arg0: i32) -> (i32, i32) {
    %c0_i32 = arith.constant 0 : i32
    %c0_i32_0 = arith.constant 0 : i32
    %c0_i32_1 = arith.constant 0 : i32
    return %c0_i32, %c0_i32_0 : i32, i32
  }
  func.func @transform_6(%arg0: i32) -> (i32, i32) {
    %c0_i32 = arith.constant 0 : i32
    %c0_i32_0 = arith.constant 0 : i32
    %c0_i32_1 = arith.constant 0 : i32
    return %c0_i32, %c0_i32_0 : i32, i32
  }
  func.func @transform_7(%arg0: i32) -> (i32, i32) {
    %c0_i32 = arith.constant 0 : i32
    %c0_i32_0 = arith.constant 0 : i32
    %c0_i32_1 = arith.constant 0 : i32
    return %c0_i32, %c0_i32_0 : i32, i32
  }
  func.func @transform_8(%arg0: i32) -> (i32, i32) {
    %c0_i32 = arith.constant 0 : i32
    %c0_i32_0 = arith.constant 0 : i32
    %c0_i32_1 = arith.constant 0 : i32
    return %c0_i32, %c0_i32_0 : i32, i32
  }
  func.func @transform_9(%arg0: i32) -> (i32, i32) {
    %c0_i32 = arith.constant 0 : i32
    %c0_i32_0 = arith.constant 0 : i32
    return %arg0, %c0_i32 : i32, i32
  }
}

</mosaic_0001>

<bundles_post_ra>
// kernel: nonlinear_fmnist_forward.1
= control target key start
LH: loop header
LB: loop body
LE: loop exit
PB: predicated region body
PF: predicated region fallthrough
CT: control target
= control target key end

     0   :  { %vm49_vm0 = vcmask 523264   ;;  %vm144_vm1 = vcmask 261120   ;;  %s684_s1 = inlined_call_operand.vmem [shape: f32[64,32], index: 1, kind: input, shape index: {}]   ;;  %s685_s0 = inlined_call_operand.vmem [shape: f32[16,64], index: 0, kind: input, shape index: {}]   ;;  %s686_s3 = inlined_call_operand.vmem [shape: f32[32,32], index: 3, kind: input, shape index: {}]   ;;  %s687_s2 = inlined_call_operand.vmem [shape: f32[1,32], index: 2, kind: input, shape index: {}]   ;;  %s688_s5 = inlined_call_operand.vmem [shape: f32[32,32], index: 5, kind: input, shape index: {}]   ;;  %s689_s4 = inlined_call_operand.vmem [shape: f32[1,32], index: 4, kind: input, shape index: {}]   ;;  %s690_s7 = inlined_call_operand.vmem [shape: f32[32,128], index: 7, kind: input, shape index: {}]   ;;  %s691_s6 = inlined_call_operand.vmem [shape: f32[1,32], index: 6, kind: input, shape index: {}]   ;;  %s692_s8 = inlined_call_operand.vmem [shape: f32[1,128], index: 8, kind: input, shape index: {}]   ;;  %s693_s9 = inlined_call_operand.vmem [shape: bf16[16,128], index: 9, kind: output, shape index: {}]  }
   0x1   :  { %v41_v0 = vld [vmem:[%s684_s1 + $0x38] sm:$0xff]  ;;  %v40_v1 = vld [vmem:[%s684_s1 + $0x30] sm:$0xff]  ;;  %v39_v2 = vld [vmem:[%s684_s1 + $0x28] sm:$0xff] }
   0x2   :  { %485 = vmatprep.subr.mxu0 %v41_v0  ;;  %v32_v3 = vld [vmem:[%s685_s0] sm:$0xff]  ;;  %v37_v5 = vld [vmem:[%s684_s1 + $0x18] sm:$0xff]  ;;  %v36_v6 = vld [vmem:[%s684_s1 + $0x10] sm:$0xff] }
   0x3   :  { %486 = vmatpush3.msra.mxu0 %v41_v0  ;;  %501 = vmatprep.mubr.msk.f32.mxu0 %vm49_vm0, %v32_v3  ;;  %v38_v4 = vld [vmem:[%s684_s1 + $0x20] sm:$0xff]  ;;  %v35_v7 = vld [vmem:[%s684_s1 + $0x8] sm:$0xff]  ;;  %v136_v10 = vld [vmem:[%s686_s3 + $0x18] sm:$0xff] }
   0x4   :  { %487 = vmatprep.subr.mxu0 %v40_v1  ;;  %v34_v8 = vld [vmem:[%s684_s1] sm:$0xff]  ;;  %v33_v9 = vld [vmem:[%s685_s0 + $0x8] sm:$0xff]  ;;  %504 = vmatprep.subr.mxu1 %v136_v10  ;;  %v135_v11 = vld [vmem:[%s686_s3 + $0x10] sm:$0xff] }
   0x5   :  { %488 = vmatpush3.msra.mxu0 %v40_v1  ;;  %505 = vmatpush3.msra.mxu1 %v136_v10  ;;  %v134_v12 = vld [vmem:[%s686_s3 + $0x8] sm:$0xff]  ;;  %v133_v13 = vld [vmem:[%s686_s3] sm:$0xff]  ;;  %v231_v21 = vld [vmem:[%s688_s5 + $0x18] sm:$0xff] }
   0x6   :  { %489 = vmatprep.subr.mxu0 %v39_v2  ;;  %506 = vmatprep.subr.mxu1 %v135_v11  ;;  %v436_v14 = vld [vmem:[%s687_s2] ss:$0 sm:$0xff]  ;;  %v230_v22 = vld [vmem:[%s688_s5 + $0x10] sm:$0xff]  ;;  %v229_v23 = vld [vmem:[%s688_s5 + $0x8] sm:$0xff] }
   0x7   :  { %490 = vmatpush3.msra.mxu0 %v39_v2  ;;  %507 = vmatpush3.msra.mxu1 %v135_v11  ;;  %v228_v24 = vld [vmem:[%s688_s5] sm:$0xff]  ;;  %v333_v32 = vld [vmem:[%s690_s7 + $0x18] sm:$0xff]  ;;  %v332_v33 = vld [vmem:[%s690_s7 + $0x10] sm:$0xff] }
   0x8   :  { %491 = vmatprep.subr.mxu0 %v38_v4  ;;  %508 = vmatprep.subr.mxu1 %v134_v12  ;;  %v439_v25 = vld [vmem:[%s689_s4] ss:$0 sm:$0xff]  ;;  %v331_v34 = vld [vmem:[%s690_s7 + $0x8] sm:$0xff] }
   0x9   :  { %492 = vmatpush3.msra.mxu0 %v38_v4  ;;  %509 = vmatpush3.msra.mxu1 %v134_v12  ;;  %v330_v35 = vld [vmem:[%s690_s7] sm:$0xff] }
   0xa   :  { %493 = vmatprep.subr.mxu0 %v37_v5  ;;  %510 = vmatprep.subr.mxu1 %v133_v13  ;;  %v442_v36 = vld [vmem:[%s691_s6] ss:$0 sm:$0xff] }
   0xb   :  { %494 = vmatpush3.msra.mxu0 %v37_v5  ;;  %511 = vmatpush3.msra.mxu1 %v133_v13  ;;  %v445_v52 = vld [vmem:[%s692_s8] ss:$0 sm:$0xff] }
   0xc   :  { %495 = vmatprep.subr.mxu0 %v36_v6  ;;  %515 = vmatprep.subr.mxu1 %v231_v21 }
   0xd   :  { %496 = vmatpush3.msra.mxu0 %v36_v6 }
   0xe   :  { %497 = vmatprep.subr.mxu0 %v35_v7 }
   0xf   :  { %498 = vmatpush3.msra.mxu0 %v35_v7 }
  0x10   :  { %499 = vmatprep.subr.mxu0 %v34_v8 }
  0x11   :  { %500 = vmatpush3.msra.mxu0 %v34_v8 }
  0x12   :  { %502 = vmatmul.mubr.msk.f32.vlgmr.msra.gmra.mxu0 %vm49_vm0, %v33_v9  ;;  %526 = vmatprep.subr.mxu0 %v333_v32 }
  0x13   :  { %527 = vmatpush3.msra.mxu0 %v333_v32 }
  0x14   :  { %528 = vmatprep.subr.mxu0 %v332_v33 }
  0x15   :  { %529 = vmatpush3.msra.mxu0 %v332_v33 }
  0x16   :  { %530 = vmatprep.subr.mxu0 %v331_v34 }
  0x17   :  { %531 = vmatpush3.msra.mxu0 %v331_v34 }
  0x18   :  { %532 = vmatprep.subr.mxu0 %v330_v35 }
  0x19   :  { %533 = vmatpush3.msra.mxu0 %v330_v35 }
  0xd2   :  { %v503_v15 = vpop.f32.mrf.mxu0 }
  0xd3   :  { %v128_v16 = vadd.f32 %v503_v15, %v436_v14 }
  0xd4   :  { %v122_v17 = vpop.f32.mrf.mxu0 }
  0xd5   :  { %v123_v18 = vadd.f32 %v436_v14, %v122_v17  ;;  %v132_v20 = vmax.f32 %v128_v16, 0.0 }
  0xd7   :  { %v131_v19 = vmax.f32 %v123_v18, 0.0 }
  0xd9   :  { %512 = vmatprep.mubr.msk.f32.mxu1 %vm144_vm1, %v131_v19 }
  0xda   :  { %513 = vmatmul.mubr.msk.f32.vlgmr.msra.gmra.mxu1 %vm144_vm1, %v132_v20 }
  0xdb   :  { %516 = vmatpush3.msra.mxu1 %v231_v21 }
  0xdc   :  { %517 = vmatprep.subr.mxu1 %v230_v22 }
  0xdd   :  { %518 = vmatpush3.msra.mxu1 %v230_v22 }
  0xde   :  { %519 = vmatprep.subr.mxu1 %v229_v23 }
  0xdf   :  { %520 = vmatpush3.msra.mxu1 %v229_v23 }
  0xe0   :  { %521 = vmatprep.subr.mxu1 %v228_v24 }
  0xe1   :  { %522 = vmatpush3.msra.mxu1 %v228_v24 }
 0x19a   :  { %v514_v26 = vpop.f32.mrf.mxu1 }
 0x19b   :  { %v223_v27 = vadd.f32 %v514_v26, %v439_v25 }
 0x19c   :  { %v217_v28 = vpop.f32.mrf.mxu1 }
 0x19d   :  { %v218_v29 = vadd.f32 %v439_v25, %v217_v28  ;;  %v227_v31 = vmax.f32 %v223_v27, 0.0 }
 0x19f   :  { %v226_v30 = vmax.f32 %v218_v29, 0.0 }
 0x1a1   :  { %523 = vmatprep.mubr.msk.f32.mxu1 %vm144_vm1, %v226_v30 }
 0x1a2   :  { %524 = vmatmul.mubr.msk.f32.vlgmr.msra.gmra.mxu1 %vm144_vm1, %v227_v31 }
 0x262   :  { %v525_v37 = vpop.f32.mrf.mxu1 }
 0x263   :  { %v317_v38 = vadd.f32 %v525_v37, %v442_v36 }
 0x264   :  { %v311_v39 = vpop.f32.mrf.mxu1 }
 0x265   :  { %v321_v40 = vsub.f32 0.0, %v317_v38  ;;  %v312_v41 = vadd.f32 %v442_v36, %v311_v39 }
 0x267   :  { %v324_v42 = vmul.f32 1.442695, %v321_v40  ;;  %v320_v43 = vsub.f32 0.0, %v312_v41 }
 0x269   :  { %537 = vpow2.f32 %v324_v42  ;;  %v322_v44 = vmul.f32 1.442695, %v320_v43 }
 0x26b   :  { %539 = vpow2.f32 %v322_v44 }
 0x276   :  { %v538_v45 = vpop.eup %537 }
 0x277   :  { %v327_v47 = vadd.f32 1.0, %v538_v45 }
 0x278   :  { %v540_v46 = vpop.eup %539 }
 0x279   :  { %v326_v48 = vadd.f32 1.0, %v540_v46 }
 0x27b   :  { %541 = vrcp.f32 %v326_v48 }
 0x27c   :  { %543 = vrcp.f32 %v327_v47 }
 0x288   :  { %v542_v49 = vpop.eup %541 }
 0x289   :  { %v544_v50 = vpop.eup %543  ;;  %534 = vmatprep.mubr.msk.f32.mxu0 %vm144_vm1, %v542_v49 }
 0x28a   :  { %535 = vmatmul.mubr.msk.f32.vlgmr.msra.gmra.mxu0 %vm144_vm1, %v544_v50 }
 0x34a   :  { %v536_v51 = vpop.f32.mrf.mxu0 }
 0x34b   :  { %v419_v54 = vadd.f32 %v536_v51, %v445_v52 }
 0x34c   :  { %v413_v53 = vpop.f32.mrf.mxu0 }
 0x34d   :  { %v414_v55 = vadd.f32 %v445_v52, %v413_v53 }
 0x34f   :  { %v455_v56 = vpack.c.bf16 %v419_v54, %v414_v55 }
 0x351   :  { %456 = vst [vmem:[%s693_s9] sm:$0xff] %v455_v56  }

</bundles_post_ra>
